<compile_context>
chip_gen: v6e
topology: v6e:2x2x1
jax: 0.10.0
libtpu: 0.0.40
codegen_flags: <defaults>
</compile_context>

<pallas_src>
import math

import jax
import jax.numpy as jnp
from jax.experimental import pallas as pl
from jax.experimental.pallas import tpu as pltpu

_LANE = 128
_SUBLANE = 8


def _build_pe_table(hidden_size: int, max_len: int = 5000) -> jnp.ndarray:
    """Sinusoidal PE table, shape (max_len, hidden_size), f32.

    Mirrors the PyTorch __init__:
      pe[:, 0::2] = sin(position * div_term)
      pe[:, 1::2] = cos(position * div_term)
    """
    position = jnp.arange(0, max_len, dtype=jnp.float32)[:, None]          # (L, 1)
    div_term = jnp.exp(
        jnp.arange(0, hidden_size, 2, dtype=jnp.float32)
        * (-math.log(10000.0) / hidden_size)
    )                                                                       # (ceil(H/2),)
    args = position * div_term                                              # (L, ceil(H/2))
    pe = jnp.zeros((max_len, hidden_size), dtype=jnp.float32)
    pe = pe.at[:, 0::2].set(jnp.sin(args))
    n_cos = pe[:, 1::2].shape[1]
    pe = pe.at[:, 1::2].set(jnp.cos(args[:, :n_cos]))
    return pe


def _pe_add_kernel(x_ref, pe_ref, o_ref):
    # x_ref / o_ref: (B, tK) or (B, tS, H); pe_ref: (1, tK) or (1, tS, H).
    # Broadcast add over the batch dim; all refs share the same dtype so the
    # add is a straight vreg-aligned VPU op with no promote/downcast.
    o_ref[...] = x_ref[...] + pe_ref[...]


def _round_up(v: int, m: int) -> int:
    return ((v + m - 1) // m) * m


def _round_down(v: int, m: int) -> int:
    return (v // m) * m


def _vmem_budget_bytes() -> int:
    """Budget for the padding-aware, double-buffered working set."""
    try:
        cap = int(pltpu.get_tpu_info().vmem_capacity_bytes)
    except Exception:
        cap = 64 * 1024 * 1024  # assume the smallest physical VMEM (v7x)
    return max(8 * 1024 * 1024, min(cap // 2, 48 * 1024 * 1024))


def _pick_tile_2d(K: int, B: int, itemsize: int, budget: int) -> int:
    """Lane-dense tK for the (B, K) fold.

    Working set per step = 2 buffers * (x + out at padded_B sublanes
    + pe at 8 sublanes) * tK * itemsize.
    """
    if K <= _LANE:
        return K
    padded_B = _round_up(max(B, 1), _SUBLANE)
    per_k = 2 * (2 * padded_B + _SUBLANE) * itemsize
    t = _round_down(max(budget // per_k, _LANE), _LANE)
    if t >= K:
        if K >= 2 * _LANE:
            # >=2 lane-dense grid steps so megacore (v7x) can use both TCs.
            t = _round_up(pl.cdiv(K, 2), _LANE)
        else:
            return K
    # Prefer an exact divisor of K near t: avoids a tiny masked tail step.
    if K % t != 0:
        d = t
        while d >= max(_LANE, t // 2):
            if K % d == 0:
                return d
            d -= _LANE
    return t


def _pick_tile_s(S: int, B: int, H: int, itemsize: int, budget: int) -> int:
    """Sublane-dense tS for (B, S, H) tiling (small-batch path)."""
    if S <= _SUBLANE:
        return S
    padded_H = _round_up(H, _LANE)
    per_s = 2 * (2 * B + 1) * padded_H * itemsize
    t = _round_down(max(budget // per_s, _SUBLANE), _SUBLANE)
    if t >= S:
        if S >= 2 * _SUBLANE:
            t = _round_up(pl.cdiv(S, 2), _SUBLANE)
        else:
            return S
    if S % t != 0:
        d = t
        while d >= max(_SUBLANE, t // 2):
            if S % d == 0:
                return d
            d -= _SUBLANE
    return t


def positional_encoding_forward(x: jnp.ndarray, pe_table: jnp.ndarray) -> jnp.ndarray:
    """x: (B, S, H); pe_table: (max_len, H). Returns x + pe_table[:S]."""
    B, S, H = x.shape
    if S > pe_table.shape[0]:
        raise ValueError("seq_len exceeds max_len of the PE table")
    dtype = x.dtype
    itemsize = dtype.itemsize
    budget = _vmem_budget_bytes()

    # Glue (slice / dtype cast / reshape) stays in plain JAX.
    pe = pe_table[:S, :].astype(dtype)

    cost = pl.CostEstimate(
        flops=B * S * H,
        transcendentals=0,
        bytes_accessed=(2 * B + 1) * S * H * itemsize,
    )
    cparams = pltpu.CompilerParams(
        dimension_semantics=("parallel",),
        vmem_limit_bytes=min(budget + 8 * 1024 * 1024, 56 * 1024 * 1024),
    )

    # NOTE: for B <= 2 the PE tile could be generated in-kernel (iota + sin/cos
    # on the otherwise-idle EUP) to cut HBM reads by up to ~1/3; table-read
    # path kept here for simplicity/robustness.
    if B >= _SUBLANE or (H % _LANE) != 0:
        # ---- 2-D folded path: (B, S*H), lane-dense tiles over S*H ----------
        K = S * H
        x2 = x.reshape(B, K)
        pe2 = pe.reshape(1, K)
        tK = _pick_tile_2d(K, B, itemsize, budget)
        grid = (pl.cdiv(K, tK),)
        out = pl.pallas_call(
            _pe_add_kernel,
            out_shape=jax.ShapeDtypeStruct((B, K), dtype),
            grid=grid,
            in_specs=[
                pl.BlockSpec((B, tK), lambda k: (0, k)),   # all batch rows per tile
                pl.BlockSpec((1, tK), lambda k: (0, k)),   # PE tile fetched once
            ],
            out_specs=pl.BlockSpec((B, tK), lambda k: (0, k)),
            compiler_params=cparams,
            cost_estimate=cost,
            input_output_aliases={0: 0},
        )(x2, pe2)
        return out.reshape(B, S, H)
    else:
        # ---- 3-D path for small batch with lane-dense H --------------------
        # Sublane dim = tS (multiple of 8), lane dim = H (multiple of 128):
        # full (8,128) utilization, unmasked stores, no 8/B VMEM inflation.
        tS = _pick_tile_s(S, B, H, itemsize, budget)
        grid = (pl.cdiv(S, tS),)
        out = pl.pallas_call(
            _pe_add_kernel,
            out_shape=jax.ShapeDtypeStruct((B, S, H), dtype),
            grid=grid,
            in_specs=[
                pl.BlockSpec((B, tS, H), lambda s: (0, s, 0)),
                pl.BlockSpec((1, tS, H), lambda s: (0, s, 0)),
            ],
            out_specs=pl.BlockSpec((B, tS, H), lambda s: (0, s, 0)),
            compiler_params=cparams,
            cost_estimate=cost,
            input_output_aliases={0: 0},
        )(x, pe.reshape(1, S, H))
        return out


if __name__ == "__main__":
    key = jax.random.PRNGKey(0)

    # Case 1: small shapes consistent with the module's forward
    # (batch=2, seq=8, hidden=32) -> exercises the 2-D (B, S*H) folded path.
    B, S, H = 2, 8, 32
    pe_table = _build_pe_table(H, max_len=64)
    x = jax.random.normal(key, (B, S, H), dtype=jnp.float32)
    ref = x + pe_table[None, :S, :]
    out = jax.block_until_ready(positional_encoding_forward(x, pe_table))
    assert out.shape == (B, S, H)
    assert jnp.allclose(out, ref, atol=1e-6), "mismatch vs reference (2-D path)"

    # Case 2: small batch with lane-dense hidden (hidden=128) -> exercises the
    # (B, tS, H) 3-D tiling path used when B < 8.
    B2, S2, H2 = 2, 16, 128
    pe_table2 = _build_pe_table(H2, max_len=64)
    x2 = jax.random.normal(jax.random.PRNGKey(0), (B2, S2, H2), dtype=jnp.float32)
    ref2 = x2 + pe_table2[None, :S2, :]
    out2 = jax.block_until_ready(positional_encoding_forward(x2, pe_table2))
    assert out2.shape == (B2, S2, H2)
    assert jnp.allclose(out2, ref2, atol=1e-6), "mismatch vs reference (3-D path)"

    print("KERNEL_OK")
</pallas_src>

<mosaic_0001>
module attributes {stable_mosaic.version = 11 : i64} {
  func.func @_pe_add_kernel(%arg0: i32, %arg1: memref<2x128xf32, #tpu.memory_space<vmem>>, %arg2: memref<1x128xf32, #tpu.memory_space<vmem>>, %arg3: memref<2x128xf32, #tpu.memory_space<vmem>>) attributes {dimension_semantics = [#tpu.dimension_semantics<parallel>], iteration_bounds = array<i64: 2>, scalar_prefetch = 0 : i64, scratch_operands = 0 : i64, tpu.core_type = #tpu.core_type<tc>, window_params = [{transform_indices = @transform_0, window_bounds = array<i64: 2, 128>}, {transform_indices = @transform_1, window_bounds = array<i64: 1, 128>}, {transform_indices = @transform_2, window_bounds = array<i64: 2, 128>}]} {
    %c0 = arith.constant 0 : index
    %c0_0 = arith.constant 0 : index
    %0 = vector.load %arg1[%c0, %c0_0] : memref<2x128xf32, #tpu.memory_space<vmem>>, vector<2x128xf32>
    %c0_1 = arith.constant 0 : index
    %c0_2 = arith.constant 0 : index
    %1 = vector.load %arg2[%c0_1, %c0_2] : memref<1x128xf32, #tpu.memory_space<vmem>>, vector<1x128xf32>
    %2 = vector.broadcast %1 : vector<1x128xf32> to vector<2x128xf32>
    %3 = arith.addf %0, %2 : vector<2x128xf32>
    %c0_3 = arith.constant 0 : index
    %c0_4 = arith.constant 0 : index
    %4 = vector.load %arg3[%c0_3, %c0_4] : memref<2x128xf32, #tpu.memory_space<vmem>>, vector<2x128xf32>
    tpu.vector_store %arg3[%c0_3, %c0_4], %3 {strides = array<i32>} : memref<2x128xf32, #tpu.memory_space<vmem>>, vector<2x128xf32>,
    return
  }
  func.func @transform_0(%arg0: i32) -> (i32, i32) {
    %c0_i32 = arith.constant 0 : i32
    %c0_i32_0 = arith.constant 0 : i32
    return %c0_i32, %arg0 : i32, i32
  }
  func.func @transform_1(%arg0: i32) -> (i32, i32) {
    %c0_i32 = arith.constant 0 : i32
    %c0_i32_0 = arith.constant 0 : i32
    return %c0_i32, %arg0 : i32, i32
  }
  func.func @transform_2(%arg0: i32) -> (i32, i32) {
    %c0_i32 = arith.constant 0 : i32
    %c0_i32_0 = arith.constant 0 : i32
    return %c0_i32, %arg0 : i32, i32
  }
}

</mosaic_0001>

<bundles_post_ra>
// kernel: tpu_custom_call.1
= control target key start
LH: loop header
LB: loop body
LE: loop exit
PB: predicated region body
PF: predicated region fallthrough
CT: control target
= control target key end

     0   :  { %7 = vsyncpa [#allocation3], 0  ;;  %s592_s0 = inlined_call_operand.hbm [shape: f32[2,256], index: 0, kind: input, shape index: {}, may-alias: {0,2}]   ;;  %s593_s1 = inlined_call_operand.vmem [shape: f32[1,256], index: 1, kind: input, shape index: {}]   ;;  %s594_s2 = inlined_call_operand.hbm [shape: f32[2,256], index: 2, kind: output, shape index: {}, may-alias: {0,2}]  }
   0x1   :  { %9 = vsyncpa [#allocation3 + $0x1], 0 }
   0x2   :  { %10 = vsyncpa [#allocation4], 0 }
   0x3   :  { %12 = vsyncpa [#allocation4 + $0x1], 0  ;;  %s446_s9 = smov 0   ;;  %s448_s10 = smov 0  }
   0x4   :  { %s450_s11 = smov 0   ;;  %s452_s12 = smov 0  }
   0x5 LB: > { %s467_s13 = sadd.s32 4294967295, %s427_s12   ;;  %s276_s14 = sadd.s32 4294967294, %s427_s12   ;;  %s427_s12 = sphi %s452_s12, %s611_s12   ;;  %s423_s11 = sphi %s450_s11, %s610_s11   ;;  %s419_s10 = sphi %s448_s10, %s609_s10   ;;  %s415_s9 = sphi %s446_s9, %s608_s9  }
   0x6   : > { %s471_s15 = sadd.s32 1, %s427_s12   ;;  %s25_s16 = sadd.s32 1, %s423_s11 }
   0x7   : > { %s22_s17 = ssub.s32 %s427_s12, %s471_s15  ;;  %p32_p0 = scmp.ne.s32.totalorder %s423_s11, %s419_s10 }
   0x8   : > { %p23_p1 = scmp.eq.s32.totalorder %s22_s17, 0  ;;  %p33_p2 = scmp.eq.s32.totalorder %s427_s12, 0 }
   0x9   : > { %p38_p3 = scmp.ne.s32.totalorder %s419_s10, %s415_s9  ;;  %p39_p4 = scmp.eq.s32.totalorder %s467_s13, 0 }
   0xa   : > { %s483_s18 = scalar_select %p23_p1, %s423_s11, %s25_s16  }
   0xb   : > { %p485_p5 = por %p33_p2, %p32_p0  ;;  %p489_p6 = por %p39_p4, %p38_p3 }
   0xc   : > { %p88_p7 = scmp.eq.s32.totalorder %s467_s13, 1  ;;  %p94_p8 = scmp.eq.s32.totalorder %s276_s14, 1 }
   0xd   : > { %s598_s20 = scalar_select %p489_p6, 1, 0 }
   0xe   : > { %p301_p10 = scmp.lt.s32.totalorder %s427_s12, 2  ;;  %p496_p11 = por %p88_p7, %p32_p0 }
   0xf   : > { %p500_p12 = por %p94_p8, %p38_p3  ;;  %s114_s23 = sand.u32 1, %s423_s11  }
  0x10   : > { %s599_s21 = scalar_select %p496_p11, 1, 0 }
  0x11   : > { %s600_s22 = scalar_select %p500_p12, 1, 0 }
  0x12   : > { %s280_s24 = sshll.u32 %s427_s12, 5  ;;  %s279_s25 = sshll.u32 %s114_s23, 1 }
  0x13   : > { %s509_s28 = scalar_lea.hbm %s592_s0, %s280_s24  ;;  %s118_s29 = scalar_lea.vmem [#allocation2], %s279_s25 }
  0x14   : > { %s125_s30 = sshll.u32 %s118_s29, 4  ;;  %p513_p13 = pnand %p301_p10, %p485_p5  ;;  %s517_s30 = int_to_ptr.vmem [resolvable:$true] %s125_s30 }
  0x15   : > { %s115_s4 = scalar_lea.sflag [#allocation3], %s114_s23  ;;  %s335_s5 = scalar_lea.hbm %s509_s28, 32 }
  0x16   : > { %p336_p2 = scmp.ne.s32.totalorder %s509_s28, %s335_s5  ;;  %p337_p3 = pneg %p513_p13 }
  0x17   : > { %s340_s8 = scalar_lea.hbm %s592_s0, 64  ;;  %p341_p5 = scmp.lt.s32.totalorder %s509_s28, %s592_s0 }
  0x18   : > { %p338_p4 = pnand %p337_p3, %p336_p2  ;;  %p342_p8 = scmp.lt.s32.totalorder %s340_s8, %s335_s5 }
  0x1a   : > { %p339_p7 = pneg %p338_p4  ;;  %p343_p10 = por %p342_p8, %p341_p5 }
  0x1c   : > { %p344_p9 = pnand %p343_p10, %p339_p7 }
  0x1e   : > { %347 = shalt.err (!%p344_p9)
}
  0x1f   : > { %s348_s17 = scalar_lea.vmem %s517_s30, 32  ;;  %s429_s19 = smov [#allocation2]  }
  0x20   : > { %p349_p0 = scmp.ne.s32.totalorder %s517_s30, %s348_s17  ;;  %s353_s23 = sshll.u32 %s429_s19, 4  ;;  %s354_s23 = int_to_ptr.vmem [resolvable:$false] %s353_s23 }
  0x21   : > { %s355_s24 = scalar_lea.vmem %s354_s23, 64  ;;  %p356_p4 = scmp.lt.s32.totalorder %s517_s30, %s354_s23 }
  0x22   : > { %p351_p1 = pnand %p349_p0, %p337_p3  ;;  %p357_p12 = scmp.lt.s32.totalorder %s355_s24, %s348_s17 }
  0x24   : > { %p352_p2 = pneg %p351_p1  ;;  %p358_p11 = por %p357_p12, %p356_p4 }
  0x26   : > { %p359_p6 = pnand %p358_p11, %p352_p2 }
  0x28   : > { %362 = shalt.err (!%p359_p6)
}
  0x29   : > { %296 = dma.hbm_to_vmem [thread:$0]  (!%p513_p13), %s509_s28, 32, %s517_s30, %s115_s4  }
  0x2a   : > { %p602_p9 = scmp.lt.s32.totalorder %s427_s12, 3  ;;  %p603_p7 = scmp.ge.s32.totalorder %s427_s12, 1 }
  0x2c   : > { %p137_p0 = pnand %p603_p7, %p602_p9 }
  0x2d   : > { %s544_s25 = sand.u32 (!%p137_p0), 1, %s419_s10   ;;  %p604_p6 = scmp.ne.s32.totalorder (!%p137_p0), %s598_s20, 0 }
  0x2e   : > { %140 = sbr.rel (%p137_p0) target bundleno = 79 (0x4f), region = 28  ;;  %s282_s26 = sshll.u32 (!%p137_p0), %s544_s25, 1 }
  0x2f   : > { %s143_s27 = scalar_lea.sflag (!%p137_p0), [#allocation3], %s544_s25  ;;  %s146_s29 = scalar_lea.vmem (!%p137_p0), [#allocation2], %s282_s26 }
  0x33   : > { %406 = dma.done.wait (%p604_p6), %s143_s27, 32  }
  0x34   : > { %408 = vsyncadd (%p604_p6), %s143_s27, 4294967264  ;;  %p170_p11 = scmp.lt.s32.totalorder %s467_s13, 1  ;;  %s169_s5 = scalar_lea.vmem [#allocation5], %s282_s26  ;;  %v173_v0 = vld [vmem:[%s146_s29] sm:$0x3] }
  0x35   : > { %s197_s6 = sshll.u32 %s169_s5, 4  ;;  %s286_s7 = sshll.u32 %s467_s13, 5  ;;  %s198_s6 = int_to_ptr.vmem [resolvable:$true] %s197_s6 }
  0x36   : > { %s171_s28 = scalar_select %p170_p11, %s467_s13, 1 }
  0x37   : > { %s195_s14 = scalar_lea.hbm %s594_s2, %s286_s7  ;;  %s184_s16 = scalar_lea.sflag [#allocation4], %s544_s25 }
  0x38   : > { %s172_s4 = scalar_lea.vmem %s593_s1, %s171_s28  ;;  %s363_s17 = scalar_lea.vmem %s198_s6, 32 }
  0x39   : > { %v284_v1 = vld [vmem:[%s172_s4] ss:$0 sm:$0xff]  ;;  %p364_p12 = scmp.ne.s32.totalorder %s198_s6, %s363_s17  ;;  %p605_p13 = scmp.ne.s32.totalorder %s599_s21, 0 }
  0x3a   : > { %v181_v2 = vadd.f32 %v284_v1, %v173_v0  ;;  %s430_s19 = smov [#allocation5]  }
  0x3b   : > { %p365_p1 = pnand %p364_p12, %p605_p13  ;;  %s367_s23 = sshll.u32 %s430_s19, 4  ;;  %s368_s23 = int_to_ptr.vmem [resolvable:$false] %s367_s23 }
  0x3c   : > { %182 = vst [vmem:[%s169_s5] sm:$0x3] %v181_v2  ;;  %s369_s24 = scalar_lea.vmem %s368_s23, 64  ;;  %p370_p5 = scmp.lt.s32.totalorder %s198_s6, %s368_s23 }
  0x3d   : > { %p366_p3 = pneg %p365_p1  ;;  %p371_p8 = scmp.lt.s32.totalorder %s369_s24, %s363_s17 }
  0x3f   : > { %p372_p10 = por %p371_p8, %p370_p5 }
  0x41   : > { %p373_p2 = pnand %p372_p10, %p366_p3 }
  0x43   : > { %376 = shalt.err (!%p373_p2)
}
  0x44   : > { %s377_s13 = scalar_lea.hbm %s195_s14, 32  ;;  %s381_s27 = scalar_lea.hbm %s594_s2, 64 }
  0x45   : > { %p378_p4 = scmp.ne.s32.totalorder %s195_s14, %s377_s13  ;;  %p382_p0 = scmp.lt.s32.totalorder %s195_s14, %s594_s2 }
  0x46   : > { %p383_p6 = scmp.lt.s32.totalorder %s381_s27, %s377_s13 }
  0x47   : > { %p379_p9 = pnand %p378_p4, %p605_p13 }
  0x48   : > { %p384_p11 = por %p383_p6, %p382_p0 }
  0x49   : > { %p380_p7 = pneg %p379_p9 }
  0x4b   : > { %p385_p12 = pnand %p384_p11, %p380_p7 }
  0x4d   : > { %388 = shalt.err (!%p385_p12)
}
  0x4e   : > { %291 = dma.vmem_to_hbm [thread:$0]  (%p605_p13), %s198_s6, 32, %s195_s14, %s184_s16  }
  0x4f PF: > { %s209_s30 = sand.u32 1, %s415_s9   ;;  %p606_p1 = scmp.ne.s32.totalorder %s600_s22, 0 }
  0x50   : > { %p607_p3 = scmp.ge.s32.totalorder %s427_s12, 2  ;;  %s210_s3 = scalar_lea.sflag [#allocation4], %s209_s30 }
  0x52   : > { %p298_p5 = pnand %p607_p3, %p606_p1 }
  0x54   : > { %p299_p8 = pneg %p298_p5 }
  0x56   : > { %410 = dma.done.wait (%p299_p8), %s210_s3, 32  }
  0x57   : > { %412 = vsyncadd (%p299_p8), %s210_s3, 4294967264  ;;  %p15_p10 = scmp.ge.s32.totalorder %s471_s15, 4   ;;  %s608_s9 = smov %s419_s10 }
  0x58   : > { %s609_s10 = smov %s423_s11  ;;  %s610_s11 = smov %s483_s18 }
  0x59   : > { %s611_s12 = smov %s471_s15  ;;  %17 = sbr.rel (!%p15_p10) target bundleno = 5 (0x5), region = 76 }
  0x5e   :  { %215 = vsyncpa [#allocation3], 1 }
  0x5f   :  { %217 = vsyncpa [#allocation3 + $0x1], 1 }
  0x60   :  { %218 = vsyncpa [#allocation4], 1 }
  0x61   :  { %220 = vsyncpa [#allocation4 + $0x1], 1 }

</bundles_post_ra>
